<compile_context>
chip_gen: v5e
topology: v5e:2x2
jax: 0.10.0
libtpu: 0.0.40
codegen_flags: <defaults>
</compile_context>

<pallas_src>
import math

import jax
import jax.numpy as jnp
from jax.experimental import pallas as pl
from jax.experimental.pallas import tpu as pltpu


def _invariant_spec(shape):
    """BlockSpec for a grid-invariant operand: full-array block, single-buffered."""
    return pl.BlockSpec(shape, lambda i: (0, 0), pipeline_mode=pl.Buffered(1))


def _rank_reduce(z, R, J, use_rank_matmul, s_ref):
    """Sum the R J-wide rank slices of z (TB, R*J) -> (TB, J), in f32."""
    if R == 1:
        return z
    if use_rank_matmul:
        # J not a multiple of 128: slice offsets are not lane-aligned, so do the
        # rank sum as one matmul with a constant 0/1 matrix (MXU has huge slack).
        return jnp.dot(z, s_ref[...], preferred_element_type=jnp.float32)
    out = z[:, 0:J]
    for r in range(1, R):
        out = out + z[:, r * J:(r + 1) * J]
    return out


def _make_fused_kernel(M, RJ, J, R, use_rank_matmul, mxu_dtype):
    """Block-diagonal modality-fused kernel.

    refs = (x_cat, w_blk, wb_cat, [rank_sum], bias, out)
    """

    def kernel(*refs):
        x_ref, w_ref, wb_ref = refs[0], refs[1], refs[2]
        idx = 3
        s_ref = None
        if use_rank_matmul:
            s_ref = refs[idx]
            idx += 1
        b_ref, o_ref = refs[idx], refs[idx + 1]

        # One MXU matmul per grid step: (TB, sum I_m) @ (sum I_m, M*R*J).
        zf = jnp.dot(x_ref[...].astype(mxu_dtype), w_ref[...],
                     preferred_element_type=jnp.float32)
        zf = zf + wb_ref[...].astype(jnp.float32)      # ones-column rows of W

        # Modality product over (128-aligned) lane chunks of width R*J.
        z = zf[:, 0:RJ]
        for m in range(1, M):
            z = z * zf[:, m * RJ:(m + 1) * RJ]

        out = _rank_reduce(z, R, J, use_rank_matmul, s_ref)
        o_ref[...] = (out + b_ref[...].astype(jnp.float32)).astype(o_ref.dtype)

    return kernel


def _make_permod_kernel(M, RJ, J, R, use_rank_matmul, mxu_dtype):
    """One-matmul-per-modality kernel (used when block-diag fusion is off).

    refs = (x_0..x_{M-1}, w_0..w_{M-1}, wb_0..wb_{M-1}, [rank_sum], bias, out)
    """

    def kernel(*refs):
        x_refs = refs[:M]
        w_refs = refs[M:2 * M]
        wb_refs = refs[2 * M:3 * M]
        idx = 3 * M
        s_ref = None
        if use_rank_matmul:
            s_ref = refs[idx]
            idx += 1
        b_ref, o_ref = refs[idx], refs[idx + 1]

        z = None
        for m in range(M):
            zm = jnp.dot(x_refs[m][...].astype(mxu_dtype), w_refs[m][...],
                         preferred_element_type=jnp.float32)
            zm = zm + wb_refs[m][...].astype(jnp.float32)
            z = zm if z is None else z * zm            # modality product, f32

        out = _rank_reduce(z, R, J, use_rank_matmul, s_ref)
        o_ref[...] = (out + b_ref[...].astype(jnp.float32)).astype(o_ref.dtype)

    return kernel


def _pick_batch_tile(B, live_cols_f32):
    """Largest batch tile <= 128 that (a) keeps the ~TB*live_cols f32
    intermediates within ~3/4 of the vreg file (no spill blowup) and
    (b) yields >= 2 grid steps when B allows (v7x has 2 TensorCores)."""
    tb_cap = max(8, min(128, (48 * 1024) // max(1, live_cols_f32)))
    tb_cap -= tb_cap % 8
    for tb in range(tb_cap, 7, -8):
        if B % tb == 0 and B // tb >= 2:
            return tb
    return B            # single full-array step (small / indivisible B)


def make_tensor_fusion_forward(Ws, bias=None, *, weight_dtype=jnp.bfloat16,
                               fuse_modalities=None, batch_tile=None):
    """Build a jitted forward for the low-rank (R > 0) TensorFusionLayer.

    Ws:   list of M weights, W[m] of shape (R, I_m + 1, J) (float32).
    bias: (1, J) output bias (None -> zeros).
    All weight re-layout / casting happens here, once — the returned callable
    contains only the (jitted) pallas_call and, in the fused path, one X concat.
    """
    M = len(Ws)
    R = int(Ws[0].shape[0])
    J = int(Ws[0].shape[-1])
    RJ = R * J
    I = [int(w.shape[1]) - 1 for w in Ws]
    Itot = sum(I)

    if bias is None:
        bias = jnp.zeros((1, J), dtype=jnp.float32)
    bias2d = jnp.asarray(bias, dtype=jnp.float32).reshape(1, J)

    # ---- one-time weight re-layout (hoisted out of the per-call path) ------
    #   W_rest[m][i, r*J + j] = W[m][r, i+1, j]   -> (I_m, R*J)   (bf16)
    #   W_bias[m][0, r*J + j] = W[m][r, 0,   j]   -> (1,   R*J)   (bf16)
    W_rests = [jnp.transpose(w[:, 1:, :], (1, 0, 2))
               .reshape(int(w.shape[1]) - 1, RJ).astype(weight_dtype) for w in Ws]
    W_biases = [w[:, 0, :].reshape(1, RJ).astype(weight_dtype) for w in Ws]

    # Rank-sum matrix S[r*J + j', j] = (j' == j), f32 so the accumulated
    # modality product is reduced exactly.
    use_rank_matmul = (R > 1) and (J % 128 != 0)
    S = jnp.tile(jnp.eye(J, dtype=jnp.float32), (R, 1)) if use_rank_matmul else None

    # Block-diagonal modality fusion (fills the 256-wide v6e/v7x MXU N dim).
    if fuse_modalities is None:
        fuse_modalities = (M >= 2 and RJ % 128 == 0 and Itot <= 1024
                           and M * RJ <= 512)
    if fuse_modalities and M >= 2:
        rows = []
        for m, wr in enumerate(W_rests):
            cols = [wr if k == m else jnp.zeros((I[m], RJ), weight_dtype)
                    for k in range(M)]
            rows.append(jnp.concatenate(cols, axis=1))
        W_blk = jnp.concatenate(rows, axis=0)                 # (Itot, M*R*J)
        Wb_cat = jnp.concatenate(W_biases, axis=1)            # (1,    M*R*J)
    else:
        fuse_modalities = False
        W_blk = Wb_cat = None

    mxu_dtype = jnp.dtype(weight_dtype)
    if fuse_modalities:
        kernel = _make_fused_kernel(M, RJ, J, R, use_rank_matmul, mxu_dtype)
        n_cols = M * RJ
        weight_args = [W_blk]
        wbias_args = [Wb_cat]
    else:
        kernel = _make_permod_kernel(M, RJ, J, R, use_rank_matmul, mxu_dtype)
        n_cols = RJ
        weight_args = list(W_rests)
        wbias_args = list(W_biases)
    s_args = [S] if use_rank_matmul else []
    live_cols = n_cols + RJ           # zf + z f32 intermediates per batch row

    weight_bytes = sum(int(a.size) * a.dtype.itemsize
                       for a in weight_args + wbias_args + s_args)
    weight_bytes += int(bias2d.size) * 4

    @jax.jit
    def forward(*Xs):
        assert len(Xs) == M, f"expected {M} modality inputs, got {len(Xs)}"
        B = Xs[0].shape[0]
        out_dtype = Xs[0].dtype

        x_args = [jnp.concatenate(Xs, axis=1)] if fuse_modalities else list(Xs)

        if batch_tile is not None:
            assert B % batch_tile == 0, "batch_tile must divide the batch size"
            TB = batch_tile
        else:
            TB = _pick_batch_tile(B, live_cols)
        grid = (B // TB,)

        in_specs = [pl.BlockSpec((TB, int(x.shape[1])), lambda i: (i, 0))
                    for x in x_args]
        for a in weight_args + wbias_args + s_args + [bias2d]:
            in_specs.append(_invariant_spec(a.shape))
        out_spec = pl.BlockSpec((TB, J), lambda i: (i, 0))

        # VMEM: double-buffered X / out tiles, single-buffered weights, plus
        # slack for the f32 intermediates the compiler may spill.
        x_bytes = sum(2 * TB * int(x.shape[1]) * x.dtype.itemsize for x in x_args)
        out_bytes = 2 * TB * J * jnp.dtype(out_dtype).itemsize
        interm_bytes = 2 * TB * live_cols * 4
        footprint = weight_bytes + x_bytes + out_bytes + interm_bytes
        vmem_limit = int(min(64 << 20, max(32 << 20, 2 * footprint + (2 << 20))))

        flops = (2 * B * sum(int(x.shape[1]) for x in x_args) * n_cols
                 + B * (M + R) * RJ)
        bytes_accessed = (sum(int(x.size) * x.dtype.itemsize for x in Xs)
                          + weight_bytes
                          + B * J * jnp.dtype(out_dtype).itemsize)

        return pl.pallas_call(
            kernel,
            out_shape=jax.ShapeDtypeStruct((B, J), out_dtype),
            grid_spec=pltpu.PrefetchScalarGridSpec(
                num_scalar_prefetch=0,
                grid=grid,
                in_specs=in_specs,
                out_specs=out_spec,
            ),
            compiler_params=pltpu.CompilerParams(
                dimension_semantics=("parallel",),
                vmem_limit_bytes=vmem_limit,
            ),
            cost_estimate=pl.CostEstimate(
                flops=int(flops), transcendentals=0,
                bytes_accessed=int(bytes_accessed)),
        )(*x_args, *weight_args, *wbias_args, *s_args, bias2d)

    return forward


def reference_forward(Xs, Ws, bias):
    """Pure-JAX f32 replica of the PyTorch forward (rank > 0 branch)."""
    B = Xs[0].shape[0]
    xis = [jnp.concatenate([jnp.ones((B, 1), x.dtype), x], axis=1) for x in Xs]
    Z = jnp.einsum('rij,li->rlj', Ws[0], xis[0])
    for m in range(1, len(Xs)):
        Z = Z * jnp.einsum('rij,li->rlj', Ws[m], xis[m])
    Z = jnp.sum(Z, axis=0).reshape(-1, Ws[0].shape[-1])
    return Z + bias


def init_params(key, I, J, R):
    """Deterministic xavier-normal init for W[m] of shape (R, I_m+1, J); bias = 0."""
    Ws = []
    keys = jax.random.split(key, len(I))
    for m, Im in enumerate(I):
        shape = (R, Im + 1, J)
        # torch xavier_normal_ fan computation for 3-D tensors.
        fan_in = shape[1] * shape[2]
        fan_out = shape[0] * shape[2]
        std = math.sqrt(2.0 / (fan_in + fan_out))
        Ws.append(std * jax.random.normal(keys[m], shape, dtype=jnp.float32))
    bias = jnp.zeros((1, J), dtype=jnp.float32)
    return Ws, bias


if __name__ == "__main__":
    # Small shapes consistent with the module: M=2 modalities, rank R=4.
    B = 2
    I = [4, 8]      # per-modality input dims
    J = 32          # output dim
    R = 4           # fusion rank  (R*J = 128 -> lane-dense fused matmul N dim)

    key = jax.random.PRNGKey(0)
    k_w, k_x0, k_x1 = jax.random.split(key, 3)

    Ws, bias = init_params(k_w, I, J, R)
    X0 = jax.random.normal(k_x0, (B, I[0]), dtype=jnp.float32)
    X1 = jax.random.normal(k_x1, (B, I[1]), dtype=jnp.float32)
    Xs = [X0, X1]

    ref = reference_forward(Xs, Ws, bias)

    # Block-diagonal modality-fused path (auto-selected for these shapes).
    fwd_fused = make_tensor_fusion_forward(Ws, bias)
    out_fused = jax.block_until_ready(fwd_fused(*Xs))
    assert out_fused.shape == (B, J), out_fused.shape
    err = float(jnp.max(jnp.abs(out_fused - ref)))
    # bf16 MXU inputs with f32 accumulation -> loose tolerance vs f32 reference.
    assert jnp.allclose(out_fused, ref, rtol=3e-2, atol=3e-2), \
        f"fused path max abs err = {err}"

    # Per-modality path (used automatically when the fusion heuristic is off).
    fwd_permod = make_tensor_fusion_forward(Ws, bias, fuse_modalities=False)
    out_permod = jax.block_until_ready(fwd_permod(*Xs))
    assert out_permod.shape == (B, J), out_permod.shape
    err = float(jnp.max(jnp.abs(out_permod - ref)))
    assert jnp.allclose(out_permod, ref, rtol=3e-2, atol=3e-2), \
        f"per-modality path max abs err = {err}"

    print("KERNEL_OK")
</pallas_src>

<mosaic_0001>
module attributes {stable_mosaic.version = 11 : i64} {
  func.func @kernel(%arg0: i32, %arg1: memref<2x12xf32, #tpu.memory_space<vmem>>, %arg2: memref<12x256xbf16, #tpu.memory_space<vmem>>, %arg3: memref<1x256xbf16, #tpu.memory_space<vmem>>, %arg4: memref<128x32xf32, #tpu.memory_space<vmem>>, %arg5: memref<1x32xf32, #tpu.memory_space<vmem>>, %arg6: memref<2x32xf32, #tpu.memory_space<vmem>>) attributes {dimension_semantics = [#tpu.dimension_semantics<parallel>], iteration_bounds = array<i64: 1>, scalar_prefetch = 0 : i64, scratch_operands = 0 : i64, tpu.core_type = #tpu.core_type<tc>, window_params = [{transform_indices = @transform_0, window_bounds = array<i64: 2, 12>}, {pipeline_mode = #tpu.pipeline_mode<synchronous>, transform_indices = @transform_1, window_bounds = array<i64: 12, 256>}, {pipeline_mode = #tpu.pipeline_mode<synchronous>, transform_indices = @transform_2, window_bounds = array<i64: 1, 256>}, {pipeline_mode = #tpu.pipeline_mode<synchronous>, transform_indices = @transform_3, window_bounds = array<i64: 128, 32>}, {pipeline_mode = #tpu.pipeline_mode<synchronous>, transform_indices = @transform_4, window_bounds = array<i64: 1, 32>}, {transform_indices = @transform_5, window_bounds = array<i64: 2, 32>}]} {
    %c0 = arith.constant 0 : index
    %c0_0 = arith.constant 0 : index
    %0 = vector.load %arg1[%c0, %c0_0] : memref<2x12xf32, #tpu.memory_space<vmem>>, vector<2x12xf32>
    %1 = arith.truncf %0 : vector<2x12xf32> to vector<2x12xbf16>
    %c0_1 = arith.constant 0 : index
    %c0_2 = arith.constant 0 : index
    %2 = vector.load %arg2[%c0_1, %c0_2] : memref<12x256xbf16, #tpu.memory_space<vmem>>, vector<12x256xbf16>
    %cst = arith.constant dense<0.000000e+00> : vector<2x256xf32>
    %3 = tpu.matmul %1, %2, %cst {dimension_numbers = #tpu.dot_dimension_numbers<[1], [0], [0], [1], [0, 0, 1, 1], [], []>} : vector<2x12xbf16>, vector<12x256xbf16>, vector<2x256xf32> -> vector<2x256xf32>
    %c0_3 = arith.constant 0 : index
    %c0_4 = arith.constant 0 : index
    %4 = vector.load %arg3[%c0_3, %c0_4] : memref<1x256xbf16, #tpu.memory_space<vmem>>, vector<1x256xbf16>
    %5 = arith.extf %4 : vector<1x256xbf16> to vector<1x256xf32>
    %6 = vector.broadcast %5 : vector<1x256xf32> to vector<2x256xf32>
    %7 = arith.addf %3, %6 : vector<2x256xf32>
    %8 = vector.extract_strided_slice %7 {offsets = [0, 0], sizes = [2, 128], strides = [1, 1]} : vector<2x256xf32> to vector<2x128xf32>
    %9 = vector.extract_strided_slice %7 {offsets = [0, 128], sizes = [2, 128], strides = [1, 1]} : vector<2x256xf32> to vector<2x128xf32>
    %10 = arith.mulf %8, %9 : vector<2x128xf32>
    %c0_5 = arith.constant 0 : index
    %c0_6 = arith.constant 0 : index
    %11 = vector.load %arg4[%c0_5, %c0_6] : memref<128x32xf32, #tpu.memory_space<vmem>>, vector<128x32xf32>
    %cst_7 = arith.constant dense<0.000000e+00> : vector<2x32xf32>
    %12 = tpu.matmul %10, %11, %cst_7 {dimension_numbers = #tpu.dot_dimension_numbers<[1], [0], [0], [1], [0, 0, 1, 1], [], []>} : vector<2x128xf32>, vector<128x32xf32>, vector<2x32xf32> -> vector<2x32xf32>
    %c0_8 = arith.constant 0 : index
    %c0_9 = arith.constant 0 : index
    %13 = vector.load %arg5[%c0_8, %c0_9] : memref<1x32xf32, #tpu.memory_space<vmem>>, vector<1x32xf32>
    %14 = vector.broadcast %13 : vector<1x32xf32> to vector<2x32xf32>
    %15 = arith.addf %12, %14 : vector<2x32xf32>
    %c0_10 = arith.constant 0 : index
    %c0_11 = arith.constant 0 : index
    %16 = vector.load %arg6[%c0_10, %c0_11] : memref<2x32xf32, #tpu.memory_space<vmem>>, vector<2x32xf32>
    tpu.vector_store %arg6[%c0_10, %c0_11], %15 {strides = array<i32>} : memref<2x32xf32, #tpu.memory_space<vmem>>, vector<2x32xf32>,
    return
  }
  func.func @transform_0(%arg0: i32) -> (i32, i32) {
    %c0_i32 = arith.constant 0 : i32
    %c0_i32_0 = arith.constant 0 : i32
    return %arg0, %c0_i32 : i32, i32
  }
  func.func @transform_1(%arg0: i32) -> (i32, i32) {
    %c0_i32 = arith.constant 0 : i32
    %c0_i32_0 = arith.constant 0 : i32
    %c0_i32_1 = arith.constant 0 : i32
    return %c0_i32, %c0_i32_0 : i32, i32
  }
  func.func @transform_2(%arg0: i32) -> (i32, i32) {
    %c0_i32 = arith.constant 0 : i32
    %c0_i32_0 = arith.constant 0 : i32
    %c0_i32_1 = arith.constant 0 : i32
    return %c0_i32, %c0_i32_0 : i32, i32
  }
  func.func @transform_3(%arg0: i32) -> (i32, i32) {
    %c0_i32 = arith.constant 0 : i32
    %c0_i32_0 = arith.constant 0 : i32
    %c0_i32_1 = arith.constant 0 : i32
    return %c0_i32, %c0_i32_0 : i32, i32
  }
  func.func @transform_4(%arg0: i32) -> (i32, i32) {
    %c0_i32 = arith.constant 0 : i32
    %c0_i32_0 = arith.constant 0 : i32
    %c0_i32_1 = arith.constant 0 : i32
    return %c0_i32, %c0_i32_0 : i32, i32
  }
  func.func @transform_5(%arg0: i32) -> (i32, i32) {
    %c0_i32 = arith.constant 0 : i32
    %c0_i32_0 = arith.constant 0 : i32
    return %arg0, %c0_i32 : i32, i32
  }
}

</mosaic_0001>

<bundles_post_ra>
// kernel: forward.1
= control target key start
LH: loop header
LB: loop body
LE: loop exit
PB: predicated region body
PF: predicated region fallthrough
CT: control target
= control target key end

     0   :  { %10 = vsyncpa [#allocation3], 0  ;;  %s322_s0 = inlined_call_operand.vmem [shape: f32[2,12], index: 0, kind: input, shape index: {}]   ;;  %s323_s1 = inlined_call_operand.hbm [shape: bf16[12,256], index: 1, kind: input, shape index: {}]   ;;  %s324_s2 = inlined_call_operand.vmem [shape: bf16[1,256], index: 2, kind: input, shape index: {}]   ;;  %s325_s3 = inlined_call_operand.hbm [shape: f32[128,32], index: 3, kind: input, shape index: {}]   ;;  %s326_s4 = inlined_call_operand.vmem [shape: f32[1,32], index: 4, kind: input, shape index: {}]   ;;  %s327_s5 = inlined_call_operand.hbm [shape: f32[2,32], index: 5, kind: output, shape index: {}]  }
   0x1   :  { %11 = vsyncpa [#allocation6], 0 }
   0x2   :  { %12 = vsyncpa [#allocation4], 0  ;;  %s19_s20 = sshll.u32 %s323_s1, 4  ;;  %s269_s21 = smov [#allocation2]   ;;  %s20_s20 = int_to_ptr.hbm [resolvable:$true] %s19_s20 }
   0x3   :  { %s21_s22 = sshll.u32 %s269_s21, 4  ;;  %s34_s25 = sshll.u32 %s325_s3, 4  ;;  %s22_s22 = int_to_ptr.vmem [resolvable:$true] %s21_s22  ;;  %s35_s25 = int_to_ptr.hbm [resolvable:$true] %s34_s25 }
   0x4   :  { %s270_s26 = smov 128   ;;  %s271_s27 = smov 8  }
   0x5   :  { %27 = dma.hbm_to_vmem [thread:$0]  %s20_s20, 256, %s22_s22, [#allocation3], %s270_s26, %s270_s26, %s271_s27  }
   0x6   :  { %s272_s28 = smov [#allocation5]  }
   0x7   :  { %s36_s29 = sshll.u32 %s272_s28, 4  ;;  %s37_s29 = int_to_ptr.vmem [resolvable:$true] %s36_s29 }
   0x8   :  { %42 = dma.hbm_to_vmem [thread:$0]  %s35_s25, 2048, %s37_s29, [#allocation6], %s270_s26, %s270_s26, %s271_s27  }
   0x9   :  { %263 = dma.done.wait [#allocation3], 256  }
   0xa   :  { %264 = vsyncadd [#allocation3], 4294967040 }
   0xb   :  { %265 = dma.done.wait [#allocation6], 2048  }
   0xc   :  { %266 = vsyncadd [#allocation6], 4294965248  ;;  %vm79_vm0 = vcmask 1045504   ;;  %v175_v0 = vld [vmem:[#allocation2] sm:$0xf]  ;;  %v128_v6 = vld [vmem:[#allocation5 + $0x78] sm:$0xff] }
   0xd   :  { %v184_v1 = vld [vmem:[#allocation2 + $0x4] sm:$0x30]  ;;  %v183_v2 = vld [vmem:[#allocation2 + $0x4] sm:$0xf]  ;;  %v177_v4 = vld [vmem:[#allocation2 + $0x8] sm:$0x30]  ;;  %133 = vmatpush.msra.mxu2 %v128_v6 }
   0xe   :  { %v176_v3 = vor.u32 %v184_v1, %v175_v0  ;;  %v54_v5 = vld [vmem:[%s322_s0] sm:$0x3]  ;;  %v180_v7 = vor.u32 %v183_v2, %v177_v4  ;;  %v126_v11 = vld [vmem:[#allocation5 + $0x68] sm:$0xff]  ;;  %vm75_vm1 = vcmask 97280   ;;  %v125_v13 = vld [vmem:[#allocation5 + $0x60] sm:$0xff]  ;;  %s273_s8 = smov [#allocation7]  }
   0xf   :  { %v127_v8 = vld [vmem:[#allocation5 + $0x70] sm:$0xff]  ;;  %v55_v10 = vpack.c.bf16 %v54_v5, %v54_v5  ;;  %v124_v14 = vld [vmem:[#allocation5 + $0x58] sm:$0xff]  ;;  %v122_v16 = vld [vmem:[#allocation5 + $0x48] sm:$0xff]  ;;  %s160_s9 = sshll.u32 %s273_s8, 4  ;;  %s162_s11 = sshll.u32 %s327_s5, 4  ;;  %vm153_vm2 = vcmask 254976   ;;  %s161_s9 = int_to_ptr.vmem [resolvable:$true] %s160_s9  ;;  %s163_s11 = int_to_ptr.hbm [resolvable:$true] %s162_s11 }
  0x10   :  { %v81_v9 = vsel %vm79_vm0, %v176_v3, 0  ;;  %v84_v12 = vsel %vm79_vm0, %v180_v7, 0  ;;  %134 = vmatpush.msra.mxu2 %v127_v8  ;;  %v123_v15 = vld [vmem:[#allocation5 + $0x50] sm:$0xff]  ;;  %v121_v17 = vld [vmem:[#allocation5 + $0x40] sm:$0xff]  ;;  %v120_v18 = vld [vmem:[#allocation5 + $0x38] sm:$0xff] }
  0x11   :  { %93 = vmatpush.bf16.msra.mxu0 %v81_v9  ;;  %106 = vmatpush.bf16.msra.mxu1 %v84_v12  ;;  %v119_v19 = vld [vmem:[#allocation5 + $0x30] sm:$0xff]  ;;  %v118_v20 = vld [vmem:[#allocation5 + $0x28] sm:$0xff]  ;;  %v117_v21 = vld [vmem:[#allocation5 + $0x20] sm:$0xff] }
  0x12   :  { %135 = vmatpush.msra.mxu2 %v126_v11  ;;  %v116_v22 = vld [vmem:[#allocation5 + $0x18] sm:$0xff]  ;;  %v115_v23 = vld [vmem:[#allocation5 + $0x10] sm:$0xff]  ;;  %v114_v24 = vld [vmem:[#allocation5 + $0x8] sm:$0xff] }
  0x13   :  { %v113_v25 = vld [vmem:[#allocation5] sm:$0xff]  ;;  %v58_v26 = vld [vmem:[%s324_s2] sm:$0x3] }
  0x14   :  { %181 = vmatmul.msk.bf16.vlgmr.msra.gmra.mxu0 %vm75_vm1, %v55_v10  ;;  %182 = vmatmul.msk.bf16.vlgmr.msra.gmra.mxu1 %vm75_vm1, %v55_v10  ;;  %v59_v27 = vunpack.c.l.bf16 %v58_v26  ;;  %v190_v39 = vld [vmem:[%s326_s4] ss:$0 sm:$0xff] }
  0x15   :  { %136 = vmatpush.msra.mxu2 %v125_v13 }
  0x16   :  { %v61_v28 = vperm.slane %v59_v27, 0  ;;  %v62_v29 = vperm.slane %v59_v27, 2 }
  0x17   :  { %137 = vmatpush.msra.mxu2 %v124_v14 }
  0x18   :  { %v65_v30 = vperm.slane %v61_v28, 0  ;;  %v66_v31 = vperm.slane %v62_v29, 0 }
  0x19   :  { %138 = vmatpush.msra.mxu2 %v123_v15 }
  0x1b   :  { %139 = vmatpush.msra.mxu2 %v122_v16 }
  0x1d   :  { %140 = vmatpush.msra.mxu2 %v121_v17 }
  0x1f   :  { %141 = vmatpush.msra.mxu2 %v120_v18 }
  0x21   :  { %142 = vmatpush.msra.mxu2 %v119_v19 }
  0x23   :  { %143 = vmatpush.msra.mxu2 %v118_v20 }
  0x25   :  { %144 = vmatpush.msra.mxu2 %v117_v21 }
  0x27   :  { %145 = vmatpush.msra.mxu2 %v116_v22 }
  0x29   :  { %146 = vmatpush.msra.mxu2 %v115_v23 }
  0x2b   :  { %147 = vmatpush.msra.mxu2 %v114_v24 }
  0x2d   :  { %148 = vmatpush.msra.mxu2 %v113_v25 }
  0x91   :  { %v95_v32 = vpop.f32.mrf.mxu0  ;;  %v108_v34 = vpop.f32.mrf.mxu1 }
  0x92   :  { %v96_v33 = vadd.f32 %v95_v32, %v65_v30  ;;  %v109_v35 = vadd.f32 %v108_v34, %v66_v31 }
  0x94   :  { %v112_v36 = vmul.f32 %v109_v35, %v96_v33 }
  0x96   :  { %149 = vmatmul.f32.vlgmr.msra.gmra.mxu2 %v112_v36 }
  0x99   :  { %v97_v37 = vpop.f32.mrf.mxu0  ;;  %v110_v38 = vpop.f32.mrf.mxu1 }
 0x119   :  { %v150_v40 = vpop.f32.mrf.mxu2 }
 0x11a   :  { %v151_v41 = vadd.f32 %v190_v39, %v150_v40 }
 0x11c   :  { %154 = vst.msk [vmem:[#allocation7] sm:$0x3] %vm153_vm2, %v151_v41 }
 0x11d   :  { %165 = dma.vmem_to_hbm [thread:$0]  %s161_s9, 32, %s163_s11, [#allocation4]  }
 0x11e   :  { %267 = dma.done.wait [#allocation4], 32  }
 0x11f   :  { %268 = vsyncadd [#allocation4], 4294967264 }
 0x120   :  { %170 = vsyncpa [#allocation3], 1 }
 0x121   :  { %171 = vsyncpa [#allocation6], 1 }
 0x122   :  { %172 = vsyncpa [#allocation4], 1 }

</bundles_post_ra>
